<compile_context>
chip_gen: v6e
topology: v6e:2x2x1
jax: 0.10.0
libtpu: 0.0.40
codegen_flags: <defaults>
</compile_context>

<pallas_src>
import jax
import jax.numpy as jnp
from jax.experimental import pallas as pl
from jax.experimental.pallas import tpu as pltpu

_LANE = 128  # TPU lane width (last-dim vreg width)


def _round_up(x, m):
    return (x + m - 1) // m * m


def _num_tensorcores():
    """Best-effort detection of TensorCores per chip (2 on v7x, else 1)."""
    try:
        kind = jax.devices()[0].device_kind.lower()
        if "v7" in kind:
            return 2
    except Exception:  # pragma: no cover - defensive, never fail the forward
        pass
    return 1


def _choose_block_b(B, num_tc, max_block=4096):
    """Batch tile selection.

    Single-TC chips (v5e/v6e): the grid is a serial loop, so use ONE grid step
    whenever B fits the cap (splitting a fits-in-VMEM batch is pure overhead).
    v7x (2 TCs): force >= 4 grid steps for large B so each core gets >= 2
    pipelined steps after the 'parallel' axis is sharded across cores.
    """
    if num_tc >= 2 and B >= 4 * 8:
        target = -(-B // 4)  # ceil(B / 4) -> >= 4 grid steps
        return min(max_block, _round_up(target, 8))
    if B <= max_block:
        return B  # single grid step
    return max_block


def mlp3_kernel(x_ref, w1_ref, b1_ref, w2_ref, b2_ref, o_ref):
    # Fused: (x @ W1 + b1) -> ReLU -> (@ W2 + b2) -> ReLU on the MXU/VPU.
    x = x_ref[...]
    h = jnp.dot(x, w1_ref[...], preferred_element_type=jnp.float32)
    h = jnp.maximum(h + b1_ref[...].astype(jnp.float32), 0.0)
    # Keep the f32 post-ReLU activation for the second matmul (robust if the
    # weights are bf16; MXU re-packs as needed).
    o = jnp.dot(h.astype(w2_ref.dtype), w2_ref[...],
                preferred_element_type=jnp.float32)
    o = jnp.maximum(o + b2_ref[...].astype(jnp.float32), 0.0)
    o_ref[...] = o.astype(o_ref.dtype)


def prepare_params(w1, b1, w2, b2, *, param_dtype=None):
    """One-time parameter prep (hoisted out of the per-call forward).

    Pads the hidden dim (W1 output lanes / W2 K) up to 128 so the intermediate
    activation is lane-dense and the second matmul's K sits on an MXU-friendly
    tile. The class (output) dim is left UNPADDED so the kernel writes exactly
    (B, num_class). Optionally casts weights to `param_dtype` (e.g. bf16);
    biases stay f32 since they are added to the f32 accumulator.
    """
    num_input, num_hidden = w1.shape
    num_class = w2.shape[1]
    ph = _round_up(num_hidden, _LANE)

    w_dtype = param_dtype if param_dtype is not None else w1.dtype
    w1p = jnp.zeros((num_input, ph), w_dtype).at[:, :num_hidden].set(
        w1.astype(w_dtype))
    b1p = jnp.zeros((1, ph), jnp.float32).at[:, :num_hidden].set(
        b1.reshape(1, -1).astype(jnp.float32))
    w2p = jnp.zeros((ph, num_class), w_dtype).at[:num_hidden, :].set(
        w2.astype(w_dtype))
    b2p = b2.reshape(1, num_class).astype(jnp.float32)
    return w1p, b1p, w2p, b2p


def mlp3_forward(x, w1p, b1p, w2p, b2p, *, block_b=None):
    """Forward pass. Expects params already prepared via `prepare_params`."""
    B, num_input = x.shape
    ph = w1p.shape[1]
    num_class = w2p.shape[1]
    out_dtype = x.dtype
    itemsize = jnp.dtype(x.dtype).itemsize
    w_itemsize = jnp.dtype(w1p.dtype).itemsize

    # Cast x at the HBM boundary if weights were prepared in a lower precision
    # (bf16 path); accumulation / bias / ReLU remain f32 inside the kernel.
    if x.dtype != w1p.dtype:
        x = x.astype(w1p.dtype)
        itemsize = jnp.dtype(x.dtype).itemsize

    # --- Grid / tile selection ---------------------------------------------
    if block_b is None:
        block_b = _choose_block_b(B, _num_tensorcores())
    grid = (pl.cdiv(B, block_b),)

    # --- Explicit VMEM budget (all inputs/outputs double-buffered) ----------
    vmem_bytes = (
        2 * block_b * num_input * itemsize                      # x tiles
        + 2 * block_b * num_class * 4                           # out tiles (<= f32)
        + 2 * (num_input * ph + ph * num_class) * w_itemsize    # weights
        + 2 * (ph + num_class) * 4                              # biases (f32)
    )
    # Headroom for compiler scratch; ceiling chosen for v7x's 64 MiB VMEM
    # (well under v5e/v6e's 128 MiB too).
    vmem_limit = min(max(vmem_bytes + (2 << 20), 8 << 20), 56 << 20)

    # --- Advisory cost estimate for the XLA scheduler -----------------------
    cost = pl.CostEstimate(
        flops=2 * B * (num_input * ph + ph * num_class),
        transcendentals=0,
        bytes_accessed=(B * num_input * itemsize
                        + B * num_class * jnp.dtype(out_dtype).itemsize
                        + (num_input * ph + ph * num_class) * w_itemsize
                        + (ph + num_class) * 4),
    )

    return pl.pallas_call(
        mlp3_kernel,
        out_shape=jax.ShapeDtypeStruct((B, num_class), out_dtype),
        grid_spec=pltpu.PrefetchScalarGridSpec(
            num_scalar_prefetch=0,
            grid=grid,
            in_specs=[
                pl.BlockSpec((block_b, num_input), lambda i: (i, 0)),   # x tile
                pl.BlockSpec((num_input, ph), lambda i: (0, 0)),        # W1 (resident)
                pl.BlockSpec((1, ph), lambda i: (0, 0)),                # b1
                pl.BlockSpec((ph, num_class), lambda i: (0, 0)),        # W2 (resident)
                pl.BlockSpec((1, num_class), lambda i: (0, 0)),         # b2
            ],
            # Unpadded output: last block dim == full array dim (legal), so the
            # kernel writes exactly (B, num_class) — no padded writeback, no
            # wrapper slice op.
            out_specs=pl.BlockSpec((block_b, num_class), lambda i: (i, 0)),
        ),
        compiler_params=pltpu.CompilerParams(
            dimension_semantics=("parallel",),   # megacore-shardable batch axis
            vmem_limit_bytes=vmem_limit,
        ),
        cost_estimate=cost,
    )(x, w1p, b1p, w2p, b2p)


def init_params(key, num_input, num_hidden, num_class, dtype=jnp.float32):
    # Deterministic init mimicking nn.Linear's U(-1/sqrt(fan_in), 1/sqrt(fan_in)).
    k1, k2, k3, k4 = jax.random.split(key, 4)
    bound1 = 1.0 / jnp.sqrt(num_input)
    bound2 = 1.0 / jnp.sqrt(num_hidden)
    w1 = jax.random.uniform(k1, (num_input, num_hidden), dtype, -bound1, bound1)
    b1 = jax.random.uniform(k2, (1, num_hidden), dtype, -bound1, bound1)
    w2 = jax.random.uniform(k3, (num_hidden, num_class), dtype, -bound2, bound2)
    b2 = jax.random.uniform(k4, (1, num_class), dtype, -bound2, bound2)
    return w1, b1, w2, b2


if __name__ == "__main__":
    # Small shapes consistent with MLP3(num_input=64, num_hidden=32, num_class=32).
    B, num_input, num_hidden, num_class = 256, 64, 32, 32

    key = jax.random.PRNGKey(0)
    kx, kp = jax.random.split(key)
    x = jax.random.normal(kx, (B, num_input), jnp.float32)
    w1, b1, w2, b2 = init_params(kp, num_input, num_hidden, num_class)

    # Parameter prep (padding) is done ONCE, outside the per-call forward.
    params = prepare_params(w1, b1, w2, b2)

    out = jax.block_until_ready(mlp3_forward(x, *params))

    # Reference check in plain JAX (same semantics as the PyTorch forward).
    ref = jnp.maximum(jnp.maximum(x @ w1 + b1, 0.0) @ w2 + b2, 0.0)
    assert out.shape == (B, num_class)
    assert jnp.allclose(out, ref, atol=1e-5, rtol=1e-5)

    print("KERNEL_OK")
</pallas_src>

<mosaic_0001>
module attributes {stable_mosaic.version = 11 : i64} {
  func.func @mlp3_kernel(%arg0: i32, %arg1: memref<256x64xf32, #tpu.memory_space<vmem>>, %arg2: memref<64x128xf32, #tpu.memory_space<vmem>>, %arg3: memref<1x128xf32, #tpu.memory_space<vmem>>, %arg4: memref<128x32xf32, #tpu.memory_space<vmem>>, %arg5: memref<1x32xf32, #tpu.memory_space<vmem>>, %arg6: memref<256x32xf32, #tpu.memory_space<vmem>>) attributes {dimension_semantics = [#tpu.dimension_semantics<parallel>], iteration_bounds = array<i64: 1>, scalar_prefetch = 0 : i64, scratch_operands = 0 : i64, tpu.core_type = #tpu.core_type<tc>, window_params = [{transform_indices = @transform_0, window_bounds = array<i64: 256, 64>}, {pipeline_mode = #tpu.pipeline_mode<synchronous>, transform_indices = @transform_1, window_bounds = array<i64: 64, 128>}, {pipeline_mode = #tpu.pipeline_mode<synchronous>, transform_indices = @transform_2, window_bounds = array<i64: 1, 128>}, {pipeline_mode = #tpu.pipeline_mode<synchronous>, transform_indices = @transform_3, window_bounds = array<i64: 128, 32>}, {pipeline_mode = #tpu.pipeline_mode<synchronous>, transform_indices = @transform_4, window_bounds = array<i64: 1, 32>}, {transform_indices = @transform_5, window_bounds = array<i64: 256, 32>}]} {
    %c0 = arith.constant 0 : index
    %c0_0 = arith.constant 0 : index
    %0 = vector.load %arg1[%c0, %c0_0] : memref<256x64xf32, #tpu.memory_space<vmem>>, vector<256x64xf32>
    %c0_1 = arith.constant 0 : index
    %c0_2 = arith.constant 0 : index
    %1 = vector.load %arg2[%c0_1, %c0_2] : memref<64x128xf32, #tpu.memory_space<vmem>>, vector<64x128xf32>
    %cst = arith.constant dense<0.000000e+00> : vector<256x128xf32>
    %2 = tpu.matmul %0, %1, %cst {dimension_numbers = #tpu.dot_dimension_numbers<[1], [0], [0], [1], [0, 0, 1, 1], [], []>} : vector<256x64xf32>, vector<64x128xf32>, vector<256x128xf32> -> vector<256x128xf32>
    %c0_3 = arith.constant 0 : index
    %c0_4 = arith.constant 0 : index
    %3 = vector.load %arg3[%c0_3, %c0_4] : memref<1x128xf32, #tpu.memory_space<vmem>>, vector<1x128xf32>
    %4 = vector.broadcast %3 : vector<1x128xf32> to vector<256x128xf32>
    %5 = arith.addf %2, %4 : vector<256x128xf32>
    %cst_5 = arith.constant 0.000000e+00 : f32
    %6 = vector.broadcast %cst_5 : f32 to vector<256x128xf32>
    %7 = arith.maximumf %5, %6 : vector<256x128xf32>
    %c0_6 = arith.constant 0 : index
    %c0_7 = arith.constant 0 : index
    %8 = vector.load %arg4[%c0_6, %c0_7] : memref<128x32xf32, #tpu.memory_space<vmem>>, vector<128x32xf32>
    %cst_8 = arith.constant dense<0.000000e+00> : vector<256x32xf32>
    %9 = tpu.matmul %7, %8, %cst_8 {dimension_numbers = #tpu.dot_dimension_numbers<[1], [0], [0], [1], [0, 0, 1, 1], [], []>} : vector<256x128xf32>, vector<128x32xf32>, vector<256x32xf32> -> vector<256x32xf32>
    %c0_9 = arith.constant 0 : index
    %c0_10 = arith.constant 0 : index
    %10 = vector.load %arg5[%c0_9, %c0_10] : memref<1x32xf32, #tpu.memory_space<vmem>>, vector<1x32xf32>
    %11 = vector.broadcast %10 : vector<1x32xf32> to vector<256x32xf32>
    %12 = arith.addf %9, %11 : vector<256x32xf32>
    %cst_11 = arith.constant 0.000000e+00 : f32
    %13 = vector.broadcast %cst_11 : f32 to vector<256x32xf32>
    %14 = arith.maximumf %12, %13 : vector<256x32xf32>
    %c0_12 = arith.constant 0 : index
    %c0_13 = arith.constant 0 : index
    %15 = vector.load %arg6[%c0_12, %c0_13] : memref<256x32xf32, #tpu.memory_space<vmem>>, vector<256x32xf32>
    tpu.vector_store %arg6[%c0_12, %c0_13], %14 {strides = array<i32>} : memref<256x32xf32, #tpu.memory_space<vmem>>, vector<256x32xf32>,
    return
  }
  func.func @transform_0(%arg0: i32) -> (i32, i32) {
    %c0_i32 = arith.constant 0 : i32
    %c0_i32_0 = arith.constant 0 : i32
    return %arg0, %c0_i32 : i32, i32
  }
  func.func @transform_1(%arg0: i32) -> (i32, i32) {
    %c0_i32 = arith.constant 0 : i32
    %c0_i32_0 = arith.constant 0 : i32
    %c0_i32_1 = arith.constant 0 : i32
    return %c0_i32, %c0_i32_0 : i32, i32
  }
  func.func @transform_2(%arg0: i32) -> (i32, i32) {
    %c0_i32 = arith.constant 0 : i32
    %c0_i32_0 = arith.constant 0 : i32
    %c0_i32_1 = arith.constant 0 : i32
    return %c0_i32, %c0_i32_0 : i32, i32
  }
  func.func @transform_3(%arg0: i32) -> (i32, i32) {
    %c0_i32 = arith.constant 0 : i32
    %c0_i32_0 = arith.constant 0 : i32
    %c0_i32_1 = arith.constant 0 : i32
    return %c0_i32, %c0_i32_0 : i32, i32
  }
  func.func @transform_4(%arg0: i32) -> (i32, i32) {
    %c0_i32 = arith.constant 0 : i32
    %c0_i32_0 = arith.constant 0 : i32
    %c0_i32_1 = arith.constant 0 : i32
    return %c0_i32, %c0_i32_0 : i32, i32
  }
  func.func @transform_5(%arg0: i32) -> (i32, i32) {
    %c0_i32 = arith.constant 0 : i32
    %c0_i32_0 = arith.constant 0 : i32
    return %arg0, %c0_i32 : i32, i32
  }
}

</mosaic_0001>

<bundles_post_ra>
// kernel: tpu_custom_call.1
= control target key start
LH: loop header
LB: loop body
LE: loop exit
PB: predicated region body
PF: predicated region fallthrough
CT: control target
= control target key end

     0   :  { %vm67_vm0 = vcmask 523264   ;;  %vm701_vm1 = vcmask 261120   ;;  %s1468_s1 = inlined_call_operand.vmem [shape: f32[64,128], index: 1, kind: input, shape index: {}]   ;;  %s1469_s0 = inlined_call_operand.vmem [shape: f32[256,64], index: 0, kind: input, shape index: {}]   ;;  %s1470_s3 = inlined_call_operand.vmem [shape: f32[128,32], index: 3, kind: input, shape index: {}]   ;;  %s1471_s2 = inlined_call_operand.vmem [shape: f32[1,128], index: 2, kind: input, shape index: {}]   ;;  %s1472_s4 = inlined_call_operand.vmem [shape: f32[1,32], index: 4, kind: input, shape index: {}]   ;;  %s1473_s5 = inlined_call_operand.vmem [shape: f32[256,32], index: 5, kind: output, shape index: {}]  }
   0x1   :  { %v59_v0 = vld [vmem:[%s1468_s1 + $0x38] sm:$0xff]  ;;  %v58_v1 = vld [vmem:[%s1468_s1 + $0x30] sm:$0xff]  ;;  %v57_v2 = vld [vmem:[%s1468_s1 + $0x28] sm:$0xff] }
   0x2   :  { %860 = vmatprep.subr.mxu0 %v59_v0  ;;  %v20_v3 = vld [vmem:[%s1469_s0] sm:$0xff]  ;;  %v55_v5 = vld [vmem:[%s1468_s1 + $0x18] sm:$0xff]  ;;  %v54_v6 = vld [vmem:[%s1468_s1 + $0x10] sm:$0xff] }
   0x3   :  { %861 = vmatpush3.msra.mxu0 %v59_v0  ;;  %876 = vmatprep.mubr.msk.f32.mxu0 %vm67_vm0, %v20_v3  ;;  %v56_v4 = vld [vmem:[%s1468_s1 + $0x20] sm:$0xff]  ;;  %v53_v7 = vld [vmem:[%s1468_s1 + $0x8] sm:$0xff]  ;;  %v436_v9 = vld [vmem:[%s1470_s3 + $0x78] sm:$0xff] }
   0x4   :  { %862 = vmatprep.subr.mxu0 %v58_v1  ;;  %v52_v8 = vld [vmem:[%s1468_s1] sm:$0xff]  ;;  %v21_v10 = vld [vmem:[%s1469_s0 + $0x8] sm:$0xff]  ;;  %1004 = vmatprep.subr.mxu1 %v436_v9  ;;  %v22_v11 = vld [vmem:[%s1469_s0 + $0x10] sm:$0xff] }
   0x5   :  { %863 = vmatpush3.msra.mxu0 %v58_v1  ;;  %v435_v12 = vld [vmem:[%s1470_s3 + $0x70] sm:$0xff]  ;;  %1020 = vmatpush3.msra.mxu1 %v436_v9  ;;  %v23_v13 = vld [vmem:[%s1469_s0 + $0x18] sm:$0xff]  ;;  %v434_v14 = vld [vmem:[%s1470_s3 + $0x68] sm:$0xff] }
   0x6   :  { %864 = vmatprep.subr.mxu0 %v57_v2  ;;  %1005 = vmatprep.subr.mxu1 %v435_v12  ;;  %v24_v15 = vld [vmem:[%s1469_s0 + $0x20] sm:$0xff]  ;;  %v25_v17 = vld [vmem:[%s1469_s0 + $0x28] sm:$0xff]  ;;  %v432_v18 = vld [vmem:[%s1470_s3 + $0x58] sm:$0xff] }
   0x7   :  { %865 = vmatpush3.msra.mxu0 %v57_v2  ;;  %1021 = vmatpush3.msra.mxu1 %v435_v12  ;;  %v433_v16 = vld [vmem:[%s1470_s3 + $0x60] sm:$0xff]  ;;  %v26_v19 = vld [vmem:[%s1469_s0 + $0x30] sm:$0xff]  ;;  %v27_v21 = vld [vmem:[%s1469_s0 + $0x38] sm:$0xff] }
   0x8   :  { %866 = vmatprep.subr.mxu0 %v56_v4  ;;  %1006 = vmatprep.subr.mxu1 %v434_v14  ;;  %v431_v20 = vld [vmem:[%s1470_s3 + $0x50] sm:$0xff]  ;;  %v430_v22 = vld [vmem:[%s1470_s3 + $0x48] sm:$0xff]  ;;  %v28_v23 = vld [vmem:[%s1469_s0 + $0x40] sm:$0xff] }
   0x9   :  { %867 = vmatpush3.msra.mxu0 %v56_v4  ;;  %1022 = vmatpush3.msra.mxu1 %v434_v14  ;;  %v429_v24 = vld [vmem:[%s1470_s3 + $0x40] sm:$0xff]  ;;  %v29_v25 = vld [vmem:[%s1469_s0 + $0x48] sm:$0xff]  ;;  %v428_v26 = vld [vmem:[%s1470_s3 + $0x38] sm:$0xff] }
   0xa   :  { %868 = vmatprep.subr.mxu0 %v55_v5  ;;  %1007 = vmatprep.subr.mxu1 %v433_v16  ;;  %v30_v27 = vld [vmem:[%s1469_s0 + $0x50] sm:$0xff]  ;;  %v31_v29 = vld [vmem:[%s1469_s0 + $0x58] sm:$0xff]  ;;  %v426_v30 = vld [vmem:[%s1470_s3 + $0x28] sm:$0xff] }
   0xb   :  { %869 = vmatpush3.msra.mxu0 %v55_v5  ;;  %1023 = vmatpush3.msra.mxu1 %v433_v16  ;;  %v427_v28 = vld [vmem:[%s1470_s3 + $0x30] sm:$0xff]  ;;  %v32_v31 = vld [vmem:[%s1469_s0 + $0x60] sm:$0xff]  ;;  %v33_v33 = vld [vmem:[%s1469_s0 + $0x68] sm:$0xff] }
   0xc   :  { %870 = vmatprep.subr.mxu0 %v54_v6  ;;  %1008 = vmatprep.subr.mxu1 %v432_v18  ;;  %v425_v32 = vld [vmem:[%s1470_s3 + $0x20] sm:$0xff]  ;;  %v34_v34 = vld [vmem:[%s1469_s0 + $0x70] sm:$0xff]  ;;  %v35_v35 = vld [vmem:[%s1469_s0 + $0x78] sm:$0xff] }
   0xd   :  { %871 = vmatpush3.msra.mxu0 %v54_v6  ;;  %1024 = vmatpush3.msra.mxu1 %v432_v18  ;;  %v36_v36 = vld [vmem:[%s1469_s0 + $0x80] sm:$0xff]  ;;  %v37_v37 = vld [vmem:[%s1469_s0 + $0x88] sm:$0xff]  ;;  %v38_v38 = vld [vmem:[%s1469_s0 + $0x90] sm:$0xff] }
   0xe   :  { %872 = vmatprep.subr.mxu0 %v53_v7  ;;  %1009 = vmatprep.subr.mxu1 %v431_v20  ;;  %v39_v39 = vld [vmem:[%s1469_s0 + $0x98] sm:$0xff]  ;;  %v40_v40 = vld [vmem:[%s1469_s0 + $0xa0] sm:$0xff]  ;;  %v41_v41 = vld [vmem:[%s1469_s0 + $0xa8] sm:$0xff] }
   0xf   :  { %873 = vmatpush3.msra.mxu0 %v53_v7  ;;  %1025 = vmatpush3.msra.mxu1 %v431_v20  ;;  %v42_v42 = vld [vmem:[%s1469_s0 + $0xb0] sm:$0xff]  ;;  %v43_v43 = vld [vmem:[%s1469_s0 + $0xb8] sm:$0xff]  ;;  %v44_v44 = vld [vmem:[%s1469_s0 + $0xc0] sm:$0xff] }
  0x10   :  { %874 = vmatprep.subr.mxu0 %v52_v8  ;;  %1010 = vmatprep.subr.mxu1 %v430_v22  ;;  %v45_v45 = vld [vmem:[%s1469_s0 + $0xc8] sm:$0xff]  ;;  %v46_v46 = vld [vmem:[%s1469_s0 + $0xd0] sm:$0xff]  ;;  %v47_v47 = vld [vmem:[%s1469_s0 + $0xd8] sm:$0xff] }
  0x11   :  { %875 = vmatpush3.msra.mxu0 %v52_v8  ;;  %1026 = vmatpush3.msra.mxu1 %v430_v22  ;;  %v48_v48 = vld [vmem:[%s1469_s0 + $0xe0] sm:$0xff]  ;;  %v49_v49 = vld [vmem:[%s1469_s0 + $0xe8] sm:$0xff]  ;;  %v50_v50 = vld [vmem:[%s1469_s0 + $0xf0] sm:$0xff] }
  0x12   :  { %877 = vmatmul.mubr.msk.f32.vlgmr.msra.gmra.mxu0 %vm67_vm0, %v21_v10  ;;  %924 = vmatprep.subr.mxu0 %v436_v9  ;;  %v51_v51 = vld [vmem:[%s1469_s0 + $0xf8] sm:$0xff]  ;;  %v423_v53 = vld [vmem:[%s1470_s3 + $0x10] sm:$0xff]  ;;  %v422_v54 = vld [vmem:[%s1470_s3 + $0x8] sm:$0xff] }
  0x13   :  { %879 = vmatprep.mubr.msk.f32.mxu0 %vm67_vm0, %v22_v11  ;;  %925 = vmatpush3.msra.mxu0 %v436_v9  ;;  %v424_v52 = vld [vmem:[%s1470_s3 + $0x18] sm:$0xff]  ;;  %v421_v55 = vld [vmem:[%s1470_s3] sm:$0xff] }
  0x14   :  { %926 = vmatprep.subr.mxu0 %v435_v12  ;;  %1011 = vmatprep.subr.mxu1 %v429_v24  ;;  %v1269_v56 = vld [vmem:[%s1471_s2] ss:$0 sm:$0xff] }
  0x15   :  { %927 = vmatpush3.msra.mxu0 %v435_v12  ;;  %1027 = vmatpush3.msra.mxu1 %v429_v24 }
  0x16   :  { %880 = vmatmul.mubr.msk.f32.gmra.mxu0 %vm67_vm0, %v23_v13  ;;  %928 = vmatprep.subr.mxu0 %v434_v14 }
  0x17   :  { %882 = vmatprep.mubr.msk.f32.mxu0 %vm67_vm0, %v24_v15  ;;  %929 = vmatpush3.msra.mxu0 %v434_v14 }
  0x18   :  { %930 = vmatprep.subr.mxu0 %v433_v16  ;;  %1012 = vmatprep.subr.mxu1 %v428_v26 }
  0x19   :  { %931 = vmatpush3.msra.mxu0 %v433_v16  ;;  %1028 = vmatpush3.msra.mxu1 %v428_v26 }
  0x1a   :  { %883 = vmatmul.mubr.msk.f32.gmra.mxu0 %vm67_vm0, %v25_v17  ;;  %932 = vmatprep.subr.mxu0 %v432_v18 }
  0x1b   :  { %885 = vmatprep.mubr.msk.f32.mxu0 %vm67_vm0, %v26_v19  ;;  %933 = vmatpush3.msra.mxu0 %v432_v18 }
  0x1c   :  { %934 = vmatprep.subr.mxu0 %v431_v20  ;;  %1013 = vmatprep.subr.mxu1 %v427_v28 }
  0x1d   :  { %935 = vmatpush3.msra.mxu0 %v431_v20  ;;  %1029 = vmatpush3.msra.mxu1 %v427_v28 }
  0x1e   :  { %886 = vmatmul.mubr.msk.f32.gmra.mxu0 %vm67_vm0, %v27_v21  ;;  %936 = vmatprep.subr.mxu0 %v430_v22 }
  0x1f   :  { %888 = vmatprep.mubr.msk.f32.mxu0 %vm67_vm0, %v28_v23  ;;  %937 = vmatpush3.msra.mxu0 %v430_v22 }
  0x20   :  { %938 = vmatprep.subr.mxu0 %v429_v24  ;;  %1014 = vmatprep.subr.mxu1 %v426_v30 }
  0x21   :  { %939 = vmatpush3.msra.mxu0 %v429_v24  ;;  %1030 = vmatpush3.msra.mxu1 %v426_v30 }
  0x22   :  { %889 = vmatmul.mubr.msk.f32.gmra.mxu0 %vm67_vm0, %v29_v25  ;;  %940 = vmatprep.subr.mxu0 %v428_v26 }
  0x23   :  { %891 = vmatprep.mubr.msk.f32.mxu0 %vm67_vm0, %v30_v27  ;;  %941 = vmatpush3.msra.mxu0 %v428_v26 }
  0x24   :  { %942 = vmatprep.subr.mxu0 %v427_v28  ;;  %1015 = vmatprep.subr.mxu1 %v425_v32 }
  0x25   :  { %943 = vmatpush3.msra.mxu0 %v427_v28  ;;  %1031 = vmatpush3.msra.mxu1 %v425_v32 }
  0x26   :  { %892 = vmatmul.mubr.msk.f32.gmra.mxu0 %vm67_vm0, %v31_v29  ;;  %944 = vmatprep.subr.mxu0 %v426_v30 }
  0x27   :  { %894 = vmatprep.mubr.msk.f32.mxu0 %vm67_vm0, %v32_v31  ;;  %945 = vmatpush3.msra.mxu0 %v426_v30 }
  0x28   :  { %946 = vmatprep.subr.mxu0 %v425_v32  ;;  %1016 = vmatprep.subr.mxu1 %v424_v52 }
  0x29   :  { %947 = vmatpush3.msra.mxu0 %v425_v32  ;;  %1032 = vmatpush3.msra.mxu1 %v424_v52 }
  0x2a   :  { %895 = vmatmul.mubr.msk.f32.gmra.mxu0 %vm67_vm0, %v33_v33  ;;  %948 = vmatprep.subr.mxu0 %v424_v52 }
  0x2b   :  { %897 = vmatprep.mubr.msk.f32.mxu0 %vm67_vm0, %v34_v34  ;;  %949 = vmatpush3.msra.mxu0 %v424_v52 }
  0x2c   :  { %950 = vmatprep.subr.mxu0 %v423_v53  ;;  %1017 = vmatprep.subr.mxu1 %v423_v53 }
  0x2d   :  { %951 = vmatpush3.msra.mxu0 %v423_v53  ;;  %1033 = vmatpush3.msra.mxu1 %v423_v53 }
  0x2e   :  { %898 = vmatmul.mubr.msk.f32.gmra.mxu0 %vm67_vm0, %v35_v35  ;;  %952 = vmatprep.subr.mxu0 %v422_v54 }
  0x2f   :  { %900 = vmatprep.mubr.msk.f32.mxu0 %vm67_vm0, %v36_v36  ;;  %1018 = vmatprep.subr.mxu1 %v422_v54 }
  0x30   :  { %953 = vmatpush3.msra.mxu0 %v422_v54  ;;  %1034 = vmatpush3.msra.mxu1 %v422_v54 }
  0x31   :  { %954 = vmatprep.subr.mxu0 %v421_v55  ;;  %1019 = vmatprep.subr.mxu1 %v421_v55 }
  0x32   :  { %901 = vmatmul.mubr.msk.f32.gmra.mxu0 %vm67_vm0, %v37_v37  ;;  %1035 = vmatpush3.msra.mxu1 %v421_v55 }
  0x33   :  { %903 = vmatprep.mubr.msk.f32.mxu0 %vm67_vm0, %v38_v38  ;;  %955 = vmatpush3.msra.mxu0 %v421_v55 }
  0x36   :  { %904 = vmatmul.mubr.msk.f32.gmra.mxu0 %vm67_vm0, %v39_v39 }
  0x37   :  { %906 = vmatprep.mubr.msk.f32.mxu0 %vm67_vm0, %v40_v40 }
  0x3a   :  { %907 = vmatmul.mubr.msk.f32.gmra.mxu0 %vm67_vm0, %v41_v41 }
  0x3b   :  { %909 = vmatprep.mubr.msk.f32.mxu0 %vm67_vm0, %v42_v42 }
  0x3e   :  { %910 = vmatmul.mubr.msk.f32.gmra.mxu0 %vm67_vm0, %v43_v43 }
  0x3f   :  { %912 = vmatprep.mubr.msk.f32.mxu0 %vm67_vm0, %v44_v44 }
  0x42   :  { %913 = vmatmul.mubr.msk.f32.gmra.mxu0 %vm67_vm0, %v45_v45 }
  0x43   :  { %915 = vmatprep.mubr.msk.f32.mxu0 %vm67_vm0, %v46_v46 }
  0x46   :  { %916 = vmatmul.mubr.msk.f32.gmra.mxu0 %vm67_vm0, %v47_v47 }
  0x47   :  { %918 = vmatprep.mubr.msk.f32.mxu0 %vm67_vm0, %v48_v48 }
  0x4a   :  { %919 = vmatmul.mubr.msk.f32.gmra.mxu0 %vm67_vm0, %v49_v49 }
  0x4b   :  { %921 = vmatprep.mubr.msk.f32.mxu0 %vm67_vm0, %v50_v50 }
  0x4e   :  { %922 = vmatmul.mubr.msk.f32.gmra.mxu0 %vm67_vm0, %v51_v51 }
  0xd2   :  { %v878_v57 = vpop.f32.mrf.mxu0 }
  0xd3   :  { %v236_v58 = vadd.f32 %v878_v57, %v1269_v56 }
  0xd4   :  { %v230_v59 = vpop.f32.mrf.mxu0 }
  0xd5   :  { %v231_v60 = vadd.f32 %v1269_v56, %v230_v59  ;;  %v390_v63 = vmax.f32 %v236_v58, 0.0 }
  0xd6   :  { %v881_v61 = vpop.f32.mrf.mxu0 }
  0xd7   :  { %v389_v62 = vmax.f32 %v231_v60, 0.0  ;;  %v246_v0 = vadd.f32 %v881_v61, %v1269_v56 }
  0xd8   :  { %v240_v1 = vpop.f32.mrf.mxu0 }
  0xd9   :  { %v241_v2 = vadd.f32 %v1269_v56, %v240_v1  ;;  %956 = vmatprep.mubr.f32.mxu0 %v389_v62  ;;  %v392_v5 = vmax.f32 %v246_v0, 0.0 }
  0xda   :  { %v884_v3 = vpop.f32.mrf.mxu0  ;;  %957 = vmatmul.mubr.f32.vlgmr.msra.gmra.mxu0 %v390_v63 }
  0xdb   :  { %v391_v4 = vmax.f32 %v241_v2, 0.0  ;;  %v256_v6 = vadd.f32 %v884_v3, %v1269_v56 }
  0xdc   :  { %v250_v7 = vpop.f32.mrf.mxu0 }
  0xdd   :  { %959 = vmatprep.mubr.f32.mxu0 %v391_v4  ;;  %v251_v8 = vadd.f32 %v1269_v56, %v250_v7  ;;  %v394_v11 = vmax.f32 %v256_v6, 0.0 }
  0xde   :  { %v887_v9 = vpop.f32.mrf.mxu0  ;;  %960 = vmatmul.mubr.f32.gmra.mxu0 %v392_v5 }
  0xdf   :  { %v393_v10 = vmax.f32 %v251_v8, 0.0  ;;  %v266_v12 = vadd.f32 %v887_v9, %v1269_v56 }
  0xe0   :  { %v260_v13 = vpop.f32.mrf.mxu0 }
  0xe1   :  { %v261_v14 = vadd.f32 %v1269_v56, %v260_v13  ;;  %962 = vmatprep.mubr.f32.mxu1 %v393_v10  ;;  %v396_v17 = vmax.f32 %v266_v12, 0.0 }
  0xe2   :  { %v890_v15 = vpop.f32.mrf.mxu0  ;;  %963 = vmatmul.mubr.f32.vlgmr.msra.gmra.mxu1 %v394_v11 }
  0xe3   :  { %v395_v16 = vmax.f32 %v261_v14, 0.0  ;;  %v276_v18 = vadd.f32 %v890_v15, %v1269_v56 }
  0xe4   :  { %v270_v19 = vpop.f32.mrf.mxu0 }
  0xe5   :  { %v271_v20 = vadd.f32 %v1269_v56, %v270_v19  ;;  %965 = vmatprep.mubr.f32.mxu1 %v395_v16  ;;  %v398_v23 = vmax.f32 %v276_v18, 0.0 }
  0xe6   :  { %v893_v21 = vpop.f32.mrf.mxu0  ;;  %966 = vmatmul.mubr.f32.gmra.mxu1 %v396_v17 }
  0xe7   :  { %v397_v22 = vmax.f32 %v271_v20, 0.0  ;;  %v286_v24 = vadd.f32 %v893_v21, %v1269_v56 }
  0xe8   :  { %v280_v25 = vpop.f32.mrf.mxu0 }
  0xe9   :  { %v281_v26 = vadd.f32 %v1269_v56, %v280_v25  ;;  %968 = vmatprep.mubr.f32.mxu1 %v397_v22  ;;  %v400_v29 = vmax.f32 %v286_v24, 0.0 }
  0xea   :  { %v896_v27 = vpop.f32.mrf.mxu0  ;;  %969 = vmatmul.mubr.f32.gmra.mxu1 %v398_v23 }
  0xeb   :  { %v399_v28 = vmax.f32 %v281_v26, 0.0  ;;  %v296_v30 = vadd.f32 %v896_v27, %v1269_v56  ;;  %v1306_v26 = vld [vmem:[%s1472_s4] ss:$0 sm:$0xff] }
  0xec   :  { %v290_v31 = vpop.f32.mrf.mxu0 }
  0xed   :  { %v291_v32 = vadd.f32 %v1269_v56, %v290_v31  ;;  %971 = vmatprep.mubr.f32.mxu1 %v399_v28  ;;  %v402_v35 = vmax.f32 %v296_v30, 0.0 }
  0xee   :  { %v899_v33 = vpop.f32.mrf.mxu0  ;;  %972 = vmatmul.mubr.f32.gmra.mxu1 %v400_v29 }
  0xef   :  { %v401_v34 = vmax.f32 %v291_v32, 0.0  ;;  %v306_v36 = vadd.f32 %v899_v33, %v1269_v56 }
  0xf0   :  { %v300_v37 = vpop.f32.mrf.mxu0 }
  0xf1   :  { %v301_v38 = vadd.f32 %v1269_v56, %v300_v37  ;;  %974 = vmatprep.mubr.f32.mxu1 %v401_v34  ;;  %v404_v41 = vmax.f32 %v306_v36, 0.0 }
  0xf2   :  { %v902_v39 = vpop.f32.mrf.mxu0  ;;  %975 = vmatmul.mubr.f32.gmra.mxu1 %v402_v35 }
  0xf3   :  { %v403_v40 = vmax.f32 %v301_v38, 0.0  ;;  %v316_v42 = vadd.f32 %v902_v39, %v1269_v56 }
  0xf4   :  { %v310_v43 = vpop.f32.mrf.mxu0 }
  0xf5   :  { %v311_v44 = vadd.f32 %v1269_v56, %v310_v43  ;;  %977 = vmatprep.mubr.f32.mxu1 %v403_v40  ;;  %v406_v47 = vmax.f32 %v316_v42, 0.0 }
  0xf6   :  { %v905_v45 = vpop.f32.mrf.mxu0  ;;  %978 = vmatmul.mubr.f32.gmra.mxu1 %v404_v41 }
  0xf7   :  { %v405_v46 = vmax.f32 %v311_v44, 0.0  ;;  %v326_v48 = vadd.f32 %v905_v45, %v1269_v56 }
  0xf8   :  { %v320_v49 = vpop.f32.mrf.mxu0 }
  0xf9   :  { %v321_v50 = vadd.f32 %v1269_v56, %v320_v49  ;;  %980 = vmatprep.mubr.f32.mxu1 %v405_v46  ;;  %v408_v53 = vmax.f32 %v326_v48, 0.0 }
  0xfa   :  { %v908_v51 = vpop.f32.mrf.mxu0  ;;  %981 = vmatmul.mubr.f32.gmra.mxu1 %v406_v47 }
  0xfb   :  { %v407_v52 = vmax.f32 %v321_v50, 0.0  ;;  %v336_v54 = vadd.f32 %v908_v51, %v1269_v56 }
  0xfc   :  { %v330_v55 = vpop.f32.mrf.mxu0 }
  0xfd   :  { %v331_v57 = vadd.f32 %v1269_v56, %v330_v55  ;;  %983 = vmatprep.mubr.f32.mxu1 %v407_v52  ;;  %v410_v60 = vmax.f32 %v336_v54, 0.0 }
  0xfe   :  { %v911_v58 = vpop.f32.mrf.mxu0  ;;  %984 = vmatmul.mubr.f32.gmra.mxu1 %v408_v53 }
  0xff   :  { %v409_v59 = vmax.f32 %v331_v57, 0.0  ;;  %v346_v61 = vadd.f32 %v911_v58, %v1269_v56 }
 0x100   :  { %v340_v62 = vpop.f32.mrf.mxu0 }
 0x101   :  { %v341_v63 = vadd.f32 %v1269_v56, %v340_v62  ;;  %986 = vmatprep.mubr.f32.mxu1 %v409_v59  ;;  %v412_v2 = vmax.f32 %v346_v61, 0.0 }
 0x102   :  { %v914_v0 = vpop.f32.mrf.mxu0  ;;  %987 = vmatmul.mubr.f32.gmra.mxu1 %v410_v60 }
 0x103   :  { %v411_v1 = vmax.f32 %v341_v63, 0.0  ;;  %v356_v3 = vadd.f32 %v914_v0, %v1269_v56 }
 0x104   :  { %v350_v4 = vpop.f32.mrf.mxu0 }
 0x105   :  { %v351_v5 = vadd.f32 %v1269_v56, %v350_v4  ;;  %989 = vmatprep.mubr.f32.mxu1 %v411_v1  ;;  %v414_v8 = vmax.f32 %v356_v3, 0.0 }
 0x106   :  { %v917_v6 = vpop.f32.mrf.mxu0  ;;  %990 = vmatmul.mubr.f32.gmra.mxu1 %v412_v2 }
 0x107   :  { %v413_v7 = vmax.f32 %v351_v5, 0.0  ;;  %v366_v9 = vadd.f32 %v917_v6, %v1269_v56 }
 0x108   :  { %v360_v10 = vpop.f32.mrf.mxu0 }
 0x109   :  { %v361_v11 = vadd.f32 %v1269_v56, %v360_v10  ;;  %992 = vmatprep.mubr.f32.mxu1 %v413_v7  ;;  %v416_v14 = vmax.f32 %v366_v9, 0.0 }
 0x10a   :  { %v920_v12 = vpop.f32.mrf.mxu0  ;;  %993 = vmatmul.mubr.f32.gmra.mxu1 %v414_v8 }
 0x10b   :  { %v415_v13 = vmax.f32 %v361_v11, 0.0  ;;  %v376_v15 = vadd.f32 %v920_v12, %v1269_v56 }
 0x10c   :  { %v370_v16 = vpop.f32.mrf.mxu0 }
 0x10d   :  { %v371_v17 = vadd.f32 %v1269_v56, %v370_v16  ;;  %995 = vmatprep.mubr.f32.mxu1 %v415_v13  ;;  %v418_v20 = vmax.f32 %v376_v15, 0.0 }
 0x10e   :  { %v923_v18 = vpop.f32.mrf.mxu0  ;;  %996 = vmatmul.mubr.f32.gmra.mxu1 %v416_v14 }
 0x10f   :  { %v417_v19 = vmax.f32 %v371_v17, 0.0  ;;  %v386_v21 = vadd.f32 %v923_v18, %v1269_v56 }
 0x110   :  { %v380_v22 = vpop.f32.mrf.mxu0 }
 0x111   :  { %v381_v23 = vadd.f32 %v1269_v56, %v380_v22  ;;  %998 = vmatprep.mubr.f32.mxu1 %v417_v19  ;;  %v420_v25 = vmax.f32 %v386_v21, 0.0 }
 0x112   :  { %999 = vmatmul.mubr.f32.gmra.mxu1 %v418_v20 }
 0x113   :  { %v419_v24 = vmax.f32 %v381_v23, 0.0 }
 0x115   :  { %1001 = vmatprep.mubr.f32.mxu1 %v419_v24 }
 0x116   :  { %1002 = vmatmul.mubr.f32.gmra.mxu1 %v420_v25 }
 0x19a   :  { %v958_v27 = vpop.f32.mrf.mxu0 }
 0x19b   :  { %v516_v28 = vadd.f32 %v958_v27, %v1306_v26 }
 0x19c   :  { %v510_v29 = vpop.f32.mrf.mxu0 }
 0x19d   :  { %v670_v30 = vmax.f32 %v516_v28, 0.0  ;;  %v511_v31 = vadd.f32 %v1306_v26, %v510_v29 }
 0x19e   :  { %v961_v56 = vpop.f32.mrf.mxu0 }
 0x19f   :  { %703 = vst.msk [vmem:[%s1473_s5 + $0x8] sm:$0xff] %vm701_vm1, %v670_v30  ;;  %v669_v32 = vmax.f32 %v511_v31, 0.0  ;;  %v526_v33 = vadd.f32 %v961_v56, %v1306_v26 }
 0x1a0   :  { %v520_v34 = vpop.f32.mrf.mxu0 }
 0x1a1   :  { %702 = vst.msk [vmem:[%s1473_s5] sm:$0xff] %vm701_vm1, %v669_v32  ;;  %v672_v35 = vmax.f32 %v526_v33, 0.0  ;;  %v521_v36 = vadd.f32 %v1306_v26, %v520_v34 }
 0x1a2   :  { %v964_v37 = vpop.f32.mrf.mxu1 }
 0x1a3   :  { %705 = vst.msk [vmem:[%s1473_s5 + $0x18] sm:$0xff] %vm701_vm1, %v672_v35  ;;  %v671_v38 = vmax.f32 %v521_v36, 0.0  ;;  %v536_v39 = vadd.f32 %v964_v37, %v1306_v26 }
 0x1a4   :  { %v530_v40 = vpop.f32.mrf.mxu1 }
 0x1a5   :  { %704 = vst.msk [vmem:[%s1473_s5 + $0x10] sm:$0xff] %vm701_vm1, %v671_v38  ;;  %v674_v41 = vmax.f32 %v536_v39, 0.0  ;;  %v531_v42 = vadd.f32 %v1306_v26, %v530_v40 }
 0x1a6   :  { %v967_v43 = vpop.f32.mrf.mxu1 }
 0x1a7   :  { %707 = vst.msk [vmem:[%s1473_s5 + $0x28] sm:$0xff] %vm701_vm1, %v674_v41  ;;  %v673_v44 = vmax.f32 %v531_v42, 0.0  ;;  %v546_v45 = vadd.f32 %v967_v43, %v1306_v26 }
 0x1a8   :  { %v540_v46 = vpop.f32.mrf.mxu1 }
 0x1a9   :  { %706 = vst.msk [vmem:[%s1473_s5 + $0x20] sm:$0xff] %vm701_vm1, %v673_v44  ;;  %v676_v47 = vmax.f32 %v546_v45, 0.0  ;;  %v541_v48 = vadd.f32 %v1306_v26, %v540_v46 }
 0x1aa   :  { %v970_v49 = vpop.f32.mrf.mxu1 }
 0x1ab   :  { %709 = vst.msk [vmem:[%s1473_s5 + $0x38] sm:$0xff] %vm701_vm1, %v676_v47  ;;  %v675_v50 = vmax.f32 %v541_v48, 0.0  ;;  %v556_v51 = vadd.f32 %v970_v49, %v1306_v26 }
 0x1ac   :  { %v550_v52 = vpop.f32.mrf.mxu1 }
 0x1ad   :  { %708 = vst.msk [vmem:[%s1473_s5 + $0x30] sm:$0xff] %vm701_vm1, %v675_v50  ;;  %v678_v53 = vmax.f32 %v556_v51, 0.0  ;;  %v551_v54 = vadd.f32 %v1306_v26, %v550_v52 }
 0x1ae   :  { %v973_v55 = vpop.f32.mrf.mxu1 }
 0x1af   :  { %711 = vst.msk [vmem:[%s1473_s5 + $0x48] sm:$0xff] %vm701_vm1, %v678_v53  ;;  %v677_v57 = vmax.f32 %v551_v54, 0.0  ;;  %v566_v58 = vadd.f32 %v973_v55, %v1306_v26 }
 0x1b0   :  { %v560_v59 = vpop.f32.mrf.mxu1 }
 0x1b1   :  { %710 = vst.msk [vmem:[%s1473_s5 + $0x40] sm:$0xff] %vm701_vm1, %v677_v57  ;;  %v680_v60 = vmax.f32 %v566_v58, 0.0  ;;  %v561_v61 = vadd.f32 %v1306_v26, %v560_v59 }
 0x1b2   :  { %v976_v62 = vpop.f32.mrf.mxu1 }
 0x1b3   :  { %713 = vst.msk [vmem:[%s1473_s5 + $0x58] sm:$0xff] %vm701_vm1, %v680_v60  ;;  %v679_v63 = vmax.f32 %v561_v61, 0.0  ;;  %v576_v0 = vadd.f32 %v976_v62, %v1306_v26 }
 0x1b4   :  { %v570_v1 = vpop.f32.mrf.mxu1 }
 0x1b5   :  { %712 = vst.msk [vmem:[%s1473_s5 + $0x50] sm:$0xff] %vm701_vm1, %v679_v63  ;;  %v682_v2 = vmax.f32 %v576_v0, 0.0  ;;  %v571_v3 = vadd.f32 %v1306_v26, %v570_v1 }
 0x1b6   :  { %v979_v4 = vpop.f32.mrf.mxu1 }
 0x1b7   :  { %715 = vst.msk [vmem:[%s1473_s5 + $0x68] sm:$0xff] %vm701_vm1, %v682_v2  ;;  %v681_v5 = vmax.f32 %v571_v3, 0.0  ;;  %v586_v6 = vadd.f32 %v979_v4, %v1306_v26 }
 0x1b8   :  { %v580_v7 = vpop.f32.mrf.mxu1 }
 0x1b9   :  { %714 = vst.msk [vmem:[%s1473_s5 + $0x60] sm:$0xff] %vm701_vm1, %v681_v5  ;;  %v684_v8 = vmax.f32 %v586_v6, 0.0  ;;  %v581_v9 = vadd.f32 %v1306_v26, %v580_v7 }
 0x1ba   :  { %v982_v10 = vpop.f32.mrf.mxu1 }
 0x1bb   :  { %717 = vst.msk [vmem:[%s1473_s5 + $0x78] sm:$0xff] %vm701_vm1, %v684_v8  ;;  %v683_v11 = vmax.f32 %v581_v9, 0.0  ;;  %v596_v12 = vadd.f32 %v982_v10, %v1306_v26 }
 0x1bc   :  { %v590_v13 = vpop.f32.mrf.mxu1 }
 0x1bd   :  { %716 = vst.msk [vmem:[%s1473_s5 + $0x70] sm:$0xff] %vm701_vm1, %v683_v11  ;;  %v686_v14 = vmax.f32 %v596_v12, 0.0  ;;  %v591_v15 = vadd.f32 %v1306_v26, %v590_v13 }
 0x1be   :  { %v985_v16 = vpop.f32.mrf.mxu1 }
 0x1bf   :  { %719 = vst.msk [vmem:[%s1473_s5 + $0x88] sm:$0xff] %vm701_vm1, %v686_v14  ;;  %v685_v17 = vmax.f32 %v591_v15, 0.0  ;;  %v606_v18 = vadd.f32 %v985_v16, %v1306_v26 }
 0x1c0   :  { %v600_v19 = vpop.f32.mrf.mxu1 }
 0x1c1   :  { %718 = vst.msk [vmem:[%s1473_s5 + $0x80] sm:$0xff] %vm701_vm1, %v685_v17  ;;  %v688_v20 = vmax.f32 %v606_v18, 0.0  ;;  %v601_v21 = vadd.f32 %v1306_v26, %v600_v19 }
 0x1c2   :  { %v988_v22 = vpop.f32.mrf.mxu1 }
 0x1c3   :  { %721 = vst.msk [vmem:[%s1473_s5 + $0x98] sm:$0xff] %vm701_vm1, %v688_v20  ;;  %v687_v23 = vmax.f32 %v601_v21, 0.0  ;;  %v616_v24 = vadd.f32 %v988_v22, %v1306_v26 }
 0x1c4   :  { %v610_v25 = vpop.f32.mrf.mxu1 }
 0x1c5   :  { %720 = vst.msk [vmem:[%s1473_s5 + $0x90] sm:$0xff] %vm701_vm1, %v687_v23  ;;  %v690_v27 = vmax.f32 %v616_v24, 0.0  ;;  %v611_v28 = vadd.f32 %v1306_v26, %v610_v25 }
 0x1c6   :  { %v991_v29 = vpop.f32.mrf.mxu1 }
 0x1c7   :  { %723 = vst.msk [vmem:[%s1473_s5 + $0xa8] sm:$0xff] %vm701_vm1, %v690_v27  ;;  %v689_v30 = vmax.f32 %v611_v28, 0.0  ;;  %v626_v31 = vadd.f32 %v991_v29, %v1306_v26 }
 0x1c8   :  { %v620_v56 = vpop.f32.mrf.mxu1 }
 0x1c9   :  { %722 = vst.msk [vmem:[%s1473_s5 + $0xa0] sm:$0xff] %vm701_vm1, %v689_v30  ;;  %v692_v32 = vmax.f32 %v626_v31, 0.0  ;;  %v621_v33 = vadd.f32 %v1306_v26, %v620_v56 }
 0x1ca   :  { %v994_v34 = vpop.f32.mrf.mxu1 }
 0x1cb   :  { %725 = vst.msk [vmem:[%s1473_s5 + $0xb8] sm:$0xff] %vm701_vm1, %v692_v32  ;;  %v691_v35 = vmax.f32 %v621_v33, 0.0  ;;  %v636_v36 = vadd.f32 %v994_v34, %v1306_v26 }
 0x1cc   :  { %v630_v37 = vpop.f32.mrf.mxu1 }
 0x1cd   :  { %724 = vst.msk [vmem:[%s1473_s5 + $0xb0] sm:$0xff] %vm701_vm1, %v691_v35  ;;  %v694_v38 = vmax.f32 %v636_v36, 0.0  ;;  %v631_v39 = vadd.f32 %v1306_v26, %v630_v37 }
 0x1ce   :  { %v997_v40 = vpop.f32.mrf.mxu1 }
 0x1cf   :  { %727 = vst.msk [vmem:[%s1473_s5 + $0xc8] sm:$0xff] %vm701_vm1, %v694_v38  ;;  %v693_v41 = vmax.f32 %v631_v39, 0.0  ;;  %v646_v42 = vadd.f32 %v997_v40, %v1306_v26 }
 0x1d0   :  { %v640_v43 = vpop.f32.mrf.mxu1 }
 0x1d1   :  { %726 = vst.msk [vmem:[%s1473_s5 + $0xc0] sm:$0xff] %vm701_vm1, %v693_v41  ;;  %v696_v44 = vmax.f32 %v646_v42, 0.0  ;;  %v641_v45 = vadd.f32 %v1306_v26, %v640_v43 }
 0x1d2   :  { %v1000_v46 = vpop.f32.mrf.mxu1 }
 0x1d3   :  { %729 = vst.msk [vmem:[%s1473_s5 + $0xd8] sm:$0xff] %vm701_vm1, %v696_v44  ;;  %v695_v47 = vmax.f32 %v641_v45, 0.0  ;;  %v656_v48 = vadd.f32 %v1000_v46, %v1306_v26 }
 0x1d4   :  { %v650_v49 = vpop.f32.mrf.mxu1 }
 0x1d5   :  { %728 = vst.msk [vmem:[%s1473_s5 + $0xd0] sm:$0xff] %vm701_vm1, %v695_v47  ;;  %v698_v50 = vmax.f32 %v656_v48, 0.0  ;;  %v651_v51 = vadd.f32 %v1306_v26, %v650_v49 }
 0x1d6   :  { %v1003_v52 = vpop.f32.mrf.mxu1 }
 0x1d7   :  { %731 = vst.msk [vmem:[%s1473_s5 + $0xe8] sm:$0xff] %vm701_vm1, %v698_v50  ;;  %v697_v53 = vmax.f32 %v651_v51, 0.0  ;;  %v666_v54 = vadd.f32 %v1003_v52, %v1306_v26 }
 0x1d8   :  { %v660_v55 = vpop.f32.mrf.mxu1 }
 0x1d9   :  { %730 = vst.msk [vmem:[%s1473_s5 + $0xe0] sm:$0xff] %vm701_vm1, %v697_v53  ;;  %v700_v57 = vmax.f32 %v666_v54, 0.0  ;;  %v661_v58 = vadd.f32 %v1306_v26, %v660_v55 }
 0x1db   :  { %733 = vst.msk [vmem:[%s1473_s5 + $0xf8] sm:$0xff] %vm701_vm1, %v700_v57  ;;  %v699_v59 = vmax.f32 %v661_v58, 0.0 }
 0x1dd   :  { %732 = vst.msk [vmem:[%s1473_s5 + $0xf0] sm:$0xff] %vm701_vm1, %v699_v59 }

</bundles_post_ra>
